<compile_context>
chip_gen: v7x
topology: tpu7x:2x2x1
jax: 0.10.0
libtpu: 0.0.40
codegen_flags: <defaults>
</compile_context>

<pallas_src>
import jax
import jax.numpy as jnp
from jax.experimental import pallas as pl
from jax.experimental.pallas import tpu as pltpu

LANE = 128                        # lane width of a vreg / MXU tile
ROW_ALIGN = 16                    # bf16 vreg is [16, 128]: keep batch rows 16-aligned
TB_MULT = 256                     # batch tile multiple (full-M MXU passes)
MAX_TB = 4096                     # max batch-tile rows per grid step
VMEM_BUDGET = 24 * 1024 * 1024    # conservative per-step budget (fits v7x / v5e)
VMEM_LIMIT = 32 * 1024 * 1024     # explicit scoped-VMEM limit for the compiler


def _round_up(n, m):
    return ((n + m - 1) // m) * m


def _mlp_kernel(x_ref, w1_ref, b1_ref, w2_ref, b2_ref, w3_ref, b3_ref, o_ref):
    # Cast activations to bf16 inside the kernel (VPU work hidden under the
    # matmuls) so x is streamed from HBM exactly once, as f32.
    x = x_ref[...].astype(jnp.bfloat16)
    # Layer 1: Linear(in, hidden_pad) + ReLU  (bf16 MXU inputs, f32 accumulate)
    h1 = jnp.dot(x, w1_ref[...], preferred_element_type=jnp.float32)
    h1 = jnp.maximum(h1 + b1_ref[...], 0.0).astype(jnp.bfloat16)
    # Layer 2: Linear(hidden_pad, hidden_pad) + ReLU
    h2 = jnp.dot(h1, w2_ref[...], preferred_element_type=jnp.float32)
    h2 = jnp.maximum(h2 + b2_ref[...], 0.0).astype(jnp.bfloat16)
    # Layer 3: Linear(hidden_pad, out_pad); bf16 store halves output HBM writeback
    out = jnp.dot(h2, w3_ref[...], preferred_element_type=jnp.float32)
    o_ref[...] = (out + b3_ref[...]).astype(o_ref.dtype)


def prepare_params(p):
    """Zero-pad hidden (100->128) and output dims to full 128-lane tiles.

    Weights are stored pre-transposed as (in_features, out_features) and cast to
    bf16 (MXU-native); biases stay f32 and are added to the f32 accumulator.
    Padding columns are zero, so results are mathematically unchanged.
    """
    in_dim, hidden = p["w1"].shape
    out_dim = p["w3"].shape[1]
    hp = _round_up(hidden, LANE)
    op = _round_up(out_dim, LANE)

    def padw(w, rows, cols):
        return jnp.pad(
            w, ((0, rows - w.shape[0]), (0, cols - w.shape[1]))
        ).astype(jnp.bfloat16)

    def padb(b, cols):
        return jnp.pad(b, ((0, 0), (0, cols - b.shape[1]))).astype(jnp.float32)

    return {
        "w1": padw(p["w1"], in_dim, hp), "b1": padb(p["b1"], hp),
        "w2": padw(p["w2"], hp, hp),     "b2": padb(p["b2"], hp),
        "w3": padw(p["w3"], hp, op),     "b3": padb(p["b3"], op),
        "out_dim": out_dim,
    }


def _choose_tile(batch, in_dim, hp, op):
    """Pick (batch-tile rows, padded batch) under a generation-safe VMEM budget."""
    b16 = _round_up(max(batch, 1), ROW_ALIGN)
    # Rough per-row VMEM bytes: double-buffered f32 input + bf16 output tiles,
    # plus f32/bf16 intermediates the compiler keeps in scratch.
    per_row = 2 * in_dim * 4 + 2 * op * 2 + 2 * hp * 4 + op * 4
    cap = min(MAX_TB, max(TB_MULT, (VMEM_BUDGET // per_row) // TB_MULT * TB_MULT))
    if b16 <= 2 * TB_MULT:
        return b16, b16                       # small batch: one small step
    # Large batch: >= 2 steps so both v7x TensorCores get work; tile a multiple
    # of 256 so the M dimension feeds full MXU passes; padding waste <= ~256/step.
    nsteps = max(2, -(-b16 // cap))
    tb = min(_round_up(-(-b16 // nsteps), TB_MULT), cap)
    return tb, _round_up(b16, tb)


def mlp_forward(x, pp):
    """x: (B, input_dim) float32.  pp: output of prepare_params()."""
    B, in_dim = x.shape
    out_dim = pp["out_dim"]
    w1, b1, w2, b2 = pp["w1"], pp["b1"], pp["w2"], pp["b2"]
    w3, b3 = pp["w3"], pp["b3"]
    hp = w2.shape[0]
    op = w3.shape[1]

    tb, b_pad = _choose_tile(B, in_dim, hp, op)
    grid = (b_pad // tb,)

    xf = x
    if b_pad != B:
        xf = jnp.pad(xf, ((0, b_pad - B), (0, 0)))

    def resident(a):  # weights/biases: same block every grid step -> stay in VMEM
        return pl.BlockSpec(a.shape, lambda i: (0, 0))

    out = pl.pallas_call(
        _mlp_kernel,
        out_shape=jax.ShapeDtypeStruct((b_pad, op), jnp.bfloat16),
        grid=grid,
        in_specs=[
            pl.BlockSpec((tb, in_dim), lambda i: (i, 0)),    # f32 activation tile
            resident(w1), resident(b1),
            resident(w2), resident(b2),
            resident(w3), resident(b3),
        ],
        out_specs=pl.BlockSpec((tb, op), lambda i: (i, 0)),  # lane-dense bf16 slab
        compiler_params=pltpu.CompilerParams(
            dimension_semantics=("parallel",),               # dual-TC sharding on v7x
            vmem_limit_bytes=VMEM_LIMIT,
        ),
    )(xf, w1, b1, w2, b2, w3, b3)

    return out[:B, :out_dim].astype(jnp.float32)


def init_params(key, input_dim, output_dim, hidden=100):
    """Deterministic init matching PyTorch nn.Linear shapes (stored transposed)."""
    ks = jax.random.split(key, 6)

    def uniform(k, shape, fan_in):
        bound = 1.0 / jnp.sqrt(fan_in)
        return jax.random.uniform(k, shape, jnp.float32, -bound, bound)

    return {
        "w1": uniform(ks[0], (input_dim, hidden), input_dim),
        "b1": uniform(ks[1], (1, hidden), input_dim),
        "w2": uniform(ks[2], (hidden, hidden), hidden),
        "b2": uniform(ks[3], (1, hidden), hidden),
        "w3": uniform(ks[4], (hidden, output_dim), hidden),
        "b3": uniform(ks[5], (1, output_dim), hidden),
    }


def reference_forward(x, p):
    """Pure-JAX reference mirroring the kernel's bf16-input / f32-accumulate policy."""
    bf = jnp.bfloat16
    h1 = jnp.dot(x.astype(bf), p["w1"].astype(bf),
                 preferred_element_type=jnp.float32) + p["b1"]
    h1 = jnp.maximum(h1, 0.0).astype(bf)
    h2 = jnp.dot(h1, p["w2"].astype(bf),
                 preferred_element_type=jnp.float32) + p["b2"]
    h2 = jnp.maximum(h2, 0.0).astype(bf)
    out = jnp.dot(h2, p["w3"].astype(bf),
                  preferred_element_type=jnp.float32) + p["b3"]
    return out.astype(bf).astype(jnp.float32)   # mirror kernel's bf16 output store


if __name__ == "__main__":
    key = jax.random.PRNGKey(0)
    k_x, k_p = jax.random.split(key)

    batch, input_dim, output_dim = 2, 32, 8
    x = jax.random.normal(k_x, (batch, input_dim), jnp.float32)
    params = init_params(k_p, input_dim, output_dim)
    padded = prepare_params(params)

    out = mlp_forward(x, padded)
    out = jax.block_until_ready(out)

    ref = reference_forward(x, params)
    assert out.shape == (batch, output_dim)
    assert jnp.allclose(out, ref, atol=1e-2, rtol=1e-2), "mismatch vs reference"

    print("KERNEL_OK")
</pallas_src>

<mosaic_0001>
module attributes {stable_mosaic.version = 11 : i64} {
  func.func @_mlp_kernel(%arg0: i32, %arg1: memref<16x32xf32, #tpu.memory_space<vmem>>, %arg2: memref<32x128xbf16, #tpu.memory_space<vmem>>, %arg3: memref<1x128xf32, #tpu.memory_space<vmem>>, %arg4: memref<128x128xbf16, #tpu.memory_space<vmem>>, %arg5: memref<1x128xf32, #tpu.memory_space<vmem>>, %arg6: memref<128x128xbf16, #tpu.memory_space<vmem>>, %arg7: memref<1x128xf32, #tpu.memory_space<vmem>>, %arg8: memref<16x128xbf16, #tpu.memory_space<vmem>>) attributes {dimension_semantics = [#tpu.dimension_semantics<parallel>], iteration_bounds = array<i64: 1>, scalar_prefetch = 0 : i64, scratch_operands = 0 : i64, tpu.core_type = #tpu.core_type<tc>, window_params = [{transform_indices = @transform_0, window_bounds = array<i64: 16, 32>}, {pipeline_mode = #tpu.pipeline_mode<synchronous>, transform_indices = @transform_1, window_bounds = array<i64: 32, 128>}, {pipeline_mode = #tpu.pipeline_mode<synchronous>, transform_indices = @transform_2, window_bounds = array<i64: 1, 128>}, {pipeline_mode = #tpu.pipeline_mode<synchronous>, transform_indices = @transform_3, window_bounds = array<i64: 128, 128>}, {pipeline_mode = #tpu.pipeline_mode<synchronous>, transform_indices = @transform_4, window_bounds = array<i64: 1, 128>}, {pipeline_mode = #tpu.pipeline_mode<synchronous>, transform_indices = @transform_5, window_bounds = array<i64: 128, 128>}, {pipeline_mode = #tpu.pipeline_mode<synchronous>, transform_indices = @transform_6, window_bounds = array<i64: 1, 128>}, {transform_indices = @transform_7, window_bounds = array<i64: 16, 128>}]} {
    %c0 = arith.constant 0 : index
    %c0_0 = arith.constant 0 : index
    %0 = vector.load %arg1[%c0, %c0_0] : memref<16x32xf32, #tpu.memory_space<vmem>>, vector<16x32xf32>
    %1 = arith.truncf %0 : vector<16x32xf32> to vector<16x32xbf16>
    %c0_1 = arith.constant 0 : index
    %c0_2 = arith.constant 0 : index
    %2 = vector.load %arg2[%c0_1, %c0_2] : memref<32x128xbf16, #tpu.memory_space<vmem>>, vector<32x128xbf16>
    %cst = arith.constant dense<0.000000e+00> : vector<16x128xf32>
    %3 = tpu.matmul %1, %2, %cst {dimension_numbers = #tpu.dot_dimension_numbers<[1], [0], [0], [1], [0, 0, 1, 1], [], []>} : vector<16x32xbf16>, vector<32x128xbf16>, vector<16x128xf32> -> vector<16x128xf32>
    %c0_3 = arith.constant 0 : index
    %c0_4 = arith.constant 0 : index
    %4 = vector.load %arg3[%c0_3, %c0_4] : memref<1x128xf32, #tpu.memory_space<vmem>>, vector<1x128xf32>
    %5 = vector.broadcast %4 : vector<1x128xf32> to vector<16x128xf32>
    %6 = arith.addf %3, %5 : vector<16x128xf32>
    %cst_5 = arith.constant 0.000000e+00 : f32
    %7 = vector.broadcast %cst_5 : f32 to vector<16x128xf32>
    %8 = arith.maximumf %6, %7 : vector<16x128xf32>
    %9 = arith.truncf %8 : vector<16x128xf32> to vector<16x128xbf16>
    %c0_6 = arith.constant 0 : index
    %c0_7 = arith.constant 0 : index
    %10 = vector.load %arg4[%c0_6, %c0_7] : memref<128x128xbf16, #tpu.memory_space<vmem>>, vector<128x128xbf16>
    %cst_8 = arith.constant dense<0.000000e+00> : vector<16x128xf32>
    %11 = tpu.matmul %9, %10, %cst_8 {dimension_numbers = #tpu.dot_dimension_numbers<[1], [0], [0], [1], [0, 0, 1, 1], [], []>} : vector<16x128xbf16>, vector<128x128xbf16>, vector<16x128xf32> -> vector<16x128xf32>
    %c0_9 = arith.constant 0 : index
    %c0_10 = arith.constant 0 : index
    %12 = vector.load %arg5[%c0_9, %c0_10] : memref<1x128xf32, #tpu.memory_space<vmem>>, vector<1x128xf32>
    %13 = vector.broadcast %12 : vector<1x128xf32> to vector<16x128xf32>
    %14 = arith.addf %11, %13 : vector<16x128xf32>
    %cst_11 = arith.constant 0.000000e+00 : f32
    %15 = vector.broadcast %cst_11 : f32 to vector<16x128xf32>
    %16 = arith.maximumf %14, %15 : vector<16x128xf32>
    %17 = arith.truncf %16 : vector<16x128xf32> to vector<16x128xbf16>
    %c0_12 = arith.constant 0 : index
    %c0_13 = arith.constant 0 : index
    %18 = vector.load %arg6[%c0_12, %c0_13] : memref<128x128xbf16, #tpu.memory_space<vmem>>, vector<128x128xbf16>
    %cst_14 = arith.constant dense<0.000000e+00> : vector<16x128xf32>
    %19 = tpu.matmul %17, %18, %cst_14 {dimension_numbers = #tpu.dot_dimension_numbers<[1], [0], [0], [1], [0, 0, 1, 1], [], []>} : vector<16x128xbf16>, vector<128x128xbf16>, vector<16x128xf32> -> vector<16x128xf32>
    %c0_15 = arith.constant 0 : index
    %c0_16 = arith.constant 0 : index
    %20 = vector.load %arg7[%c0_15, %c0_16] : memref<1x128xf32, #tpu.memory_space<vmem>>, vector<1x128xf32>
    %21 = vector.broadcast %20 : vector<1x128xf32> to vector<16x128xf32>
    %22 = arith.addf %19, %21 : vector<16x128xf32>
    %23 = arith.truncf %22 : vector<16x128xf32> to vector<16x128xbf16>
    %c0_17 = arith.constant 0 : index
    %c0_18 = arith.constant 0 : index
    %24 = vector.load %arg8[%c0_17, %c0_18] : memref<16x128xbf16, #tpu.memory_space<vmem>>, vector<16x128xbf16>
    tpu.vector_store %arg8[%c0_17, %c0_18], %23 {strides = array<i32>} : memref<16x128xbf16, #tpu.memory_space<vmem>>, vector<16x128xbf16>,
    return
  }
  func.func @transform_0(%arg0: i32) -> (i32, i32) {
    %c0_i32 = arith.constant 0 : i32
    %c0_i32_0 = arith.constant 0 : i32
    return %arg0, %c0_i32 : i32, i32
  }
  func.func @transform_1(%arg0: i32) -> (i32, i32) {
    %c0_i32 = arith.constant 0 : i32
    %c0_i32_0 = arith.constant 0 : i32
    %c0_i32_1 = arith.constant 0 : i32
    return %c0_i32, %c0_i32_0 : i32, i32
  }
  func.func @transform_2(%arg0: i32) -> (i32, i32) {
    %c0_i32 = arith.constant 0 : i32
    %c0_i32_0 = arith.constant 0 : i32
    %c0_i32_1 = arith.constant 0 : i32
    return %c0_i32, %c0_i32_0 : i32, i32
  }
  func.func @transform_3(%arg0: i32) -> (i32, i32) {
    %c0_i32 = arith.constant 0 : i32
    %c0_i32_0 = arith.constant 0 : i32
    %c0_i32_1 = arith.constant 0 : i32
    return %c0_i32, %c0_i32_0 : i32, i32
  }
  func.func @transform_4(%arg0: i32) -> (i32, i32) {
    %c0_i32 = arith.constant 0 : i32
    %c0_i32_0 = arith.constant 0 : i32
    %c0_i32_1 = arith.constant 0 : i32
    return %c0_i32, %c0_i32_0 : i32, i32
  }
  func.func @transform_5(%arg0: i32) -> (i32, i32) {
    %c0_i32 = arith.constant 0 : i32
    %c0_i32_0 = arith.constant 0 : i32
    %c0_i32_1 = arith.constant 0 : i32
    return %c0_i32, %c0_i32_0 : i32, i32
  }
  func.func @transform_6(%arg0: i32) -> (i32, i32) {
    %c0_i32 = arith.constant 0 : i32
    %c0_i32_0 = arith.constant 0 : i32
    %c0_i32_1 = arith.constant 0 : i32
    return %c0_i32, %c0_i32_0 : i32, i32
  }
  func.func @transform_7(%arg0: i32) -> (i32, i32) {
    %c0_i32 = arith.constant 0 : i32
    %c0_i32_0 = arith.constant 0 : i32
    return %arg0, %c0_i32 : i32, i32
  }
}

</mosaic_0001>

<bundles_post_ra>
// kernel: tpu_custom_call.1
= control target key start
LH: loop header
LB: loop body
LE: loop exit
PB: predicated region body
PF: predicated region fallthrough
CT: control target
= control target key end

     0   :  { %12 = vsyncpa [#allocation3], 0  ;;  %s823_s0 = inlined_call_operand.hbm [shape: f32[16,32], index: 0, kind: input, shape index: {}]   ;;  %s824_s1 = inlined_call_operand.hbm [shape: bf16[32,128], index: 1, kind: input, shape index: {}]   ;;  %s825_s2 = inlined_call_operand.vmem [shape: f32[1,128], index: 2, kind: input, shape index: {}]   ;;  %s826_s3 = inlined_call_operand.hbm [shape: bf16[128,128], index: 3, kind: input, shape index: {}]   ;;  %s827_s4 = inlined_call_operand.vmem [shape: f32[1,128], index: 4, kind: input, shape index: {}]   ;;  %s828_s5 = inlined_call_operand.hbm [shape: bf16[128,128], index: 5, kind: input, shape index: {}]   ;;  %s829_s6 = inlined_call_operand.vmem [shape: f32[1,128], index: 6, kind: input, shape index: {}]   ;;  %s830_s7 = inlined_call_operand.hbm [shape: bf16[16,128], index: 7, kind: output, shape index: {}]  }
   0x1   :  { %13 = vsyncpa [#allocation6], 0 }
   0x2   :  { %14 = vsyncpa [#allocation9], 0 }
   0x3   :  { %15 = vsyncpa [#allocation4], 0  ;;  %s660_s24 = smov [#allocation5]   ;;  %s542_s28 = scalar_lea.hbm %s824_s1, 256 }
   0x4   :  { %s33_s25 = sshll.u32 %s660_s24, 4  ;;  %p543_p0 = scmp.ne.s32.totalorder %s824_s1, %s542_s28  ;;  %s34_s25 = int_to_ptr.vmem [resolvable:$true] %s33_s25 }
   0x5   :  { %p546_p1 = scmp.lt.u32.totalorder %s542_s28, %s824_s1 }
   0x7   :  { %p548_p2 = pnand %p546_p1, %p543_p0 }
   0x9   :  { %551 = shalt.err (!%p548_p2)
}
   0xa   :  { %s552_s10 = scalar_lea.vmem %s34_s25, 256  ;;  %p557_p4 = scmp.lt.s32.totalorder %s34_s25, %s34_s25 }
   0xb   :  { %p553_p3 = scmp.ne.s32.totalorder %s34_s25, %s552_s10  ;;  %p558_p5 = scmp.lt.s32.totalorder %s552_s10, %s552_s10 }
   0xd   :  { %p559_p6 = por %p558_p5, %p557_p4 }
   0xf   :  { %p560_p7 = pnand %p559_p6, %p553_p3 }
  0x11   :  { %563 = shalt.err (!%p560_p7)
}
  0x12   :  { %s661_s11 = smov 64   ;;  %s662_s12 = smov 4  }
  0x13   :  { %39 = dma.hbm_to_vmem [thread:$0]  %s824_s1, 256, %s34_s25, [#allocation6], %s661_s11, %s661_s11, %s662_s12  }
  0x14   :  { %s663_s15 = smov [#allocation2]   ;;  %s564_s19 = scalar_lea.hbm %s823_s0, 256 }
  0x15   :  { %s21_s16 = sshll.u32 %s663_s15, 4  ;;  %p565_p8 = scmp.ne.s32.totalorder %s823_s0, %s564_s19  ;;  %s22_s16 = int_to_ptr.vmem [resolvable:$true] %s21_s16 }
  0x16   :  { %p568_p9 = scmp.lt.u32.totalorder %s564_s19, %s823_s0 }
  0x18   :  { %p570_p10 = pnand %p568_p9, %p565_p8 }
  0x1a   :  { %573 = shalt.err (!%p570_p10)
}
  0x1b   :  { %s574_s24 = scalar_lea.vmem %s22_s16, 256  ;;  %p579_p12 = scmp.lt.s32.totalorder %s22_s16, %s22_s16 }
  0x1c   :  { %p575_p11 = scmp.ne.s32.totalorder %s22_s16, %s574_s24  ;;  %p580_p13 = scmp.lt.s32.totalorder %s574_s24, %s574_s24 }
  0x1e   :  { %p581_p0 = por %p580_p13, %p579_p12 }
  0x20   :  { %p582_p1 = pnand %p581_p0, %p575_p11 }
  0x22   :  { %585 = shalt.err (!%p582_p1)
}
  0x23   :  { %s664_s1 = smov 128   ;;  %s665_s25 = smov 8  }
  0x24   :  { %27 = dma.hbm_to_vmem [thread:$0]  %s823_s0, 256, %s22_s16, [#allocation3], %s664_s1, %s664_s1, %s665_s25  }
  0x25   :  { %s666_s28 = smov [#allocation7]   ;;  %s667_s30 = smov [#allocation8]  }
  0x26   :  { %s47_s29 = sshll.u32 %s666_s28, 4  ;;  %s61_s8 = sshll.u32 %s667_s30, 4  ;;  %s48_s29 = int_to_ptr.vmem [resolvable:$true] %s47_s29  ;;  %s738_s8 = int_to_ptr.vmem [resolvable:$true] %s61_s8 }
  0x27   :  { %s586_s13 = scalar_lea.hbm %s826_s3, 1024 }
  0x28   :  { %p587_p2 = scmp.ne.s32.totalorder %s826_s3, %s586_s13  ;;  %p590_p3 = scmp.lt.u32.totalorder %s586_s13, %s826_s3 }
  0x2a   :  { %p592_p4 = pnand %p590_p3, %p587_p2 }
  0x2c   :  { %595 = shalt.err (!%p592_p4)
}
  0x2d   :  { %s596_s0 = scalar_lea.vmem %s48_s29, 1024  ;;  %p601_p6 = scmp.lt.s32.totalorder %s48_s29, %s48_s29 }
  0x2e   :  { %p597_p5 = scmp.ne.s32.totalorder %s48_s29, %s596_s0  ;;  %p602_p7 = scmp.lt.s32.totalorder %s596_s0, %s596_s0 }
  0x30   :  { %p603_p8 = por %p602_p7, %p601_p6 }
  0x32   :  { %p604_p9 = pnand %p603_p8, %p597_p5 }
  0x34   :  { %607 = shalt.err (!%p604_p9)
}
  0x35   :  { %53 = dma.hbm_to_vmem [thread:$0]  %s826_s3, 1024, %s48_s29, [#allocation6], %s661_s11, %s661_s11, %s662_s12  }
  0x36   :  { %s608_s22 = scalar_lea.hbm %s828_s5, 1024 }
  0x37   :  { %p609_p10 = scmp.ne.s32.totalorder %s828_s5, %s608_s22  ;;  %p612_p11 = scmp.lt.u32.totalorder %s608_s22, %s828_s5 }
  0x39   :  { %p614_p12 = pnand %p612_p11, %p609_p10 }
  0x3b   :  { %617 = shalt.err (!%p614_p12)
}
  0x3c   :  { %s618_s26 = scalar_lea.vmem %s738_s8, 1024  ;;  %p623_p0 = scmp.lt.s32.totalorder %s738_s8, %s738_s8 }
  0x3d   :  { %p619_p13 = scmp.ne.s32.totalorder %s738_s8, %s618_s26  ;;  %p624_p1 = scmp.lt.s32.totalorder %s618_s26, %s618_s26 }
  0x3f   :  { %p625_p2 = por %p624_p1, %p623_p0 }
  0x41   :  { %p626_p3 = pnand %p625_p2, %p619_p13 }
  0x43   :  { %629 = shalt.err (!%p626_p3)
}
  0x44   :  { %67 = dma.hbm_to_vmem [thread:$0]  %s828_s5, 1024, %s738_s8, [#allocation9], %s661_s11, %s661_s11, %s662_s12  }
  0x45   :  { %652 = dma.done.wait [#allocation3], 256  }
  0x46   :  { %653 = vsyncadd [#allocation3], 4294967040 }
  0x47   :  { %654 = dma.done.wait [#allocation6], 1280  }
  0x48   :  { %655 = vsyncadd [#allocation6], 4294966016 }
  0x49   :  { %656 = dma.done.wait [#allocation9], 1024  }
  0x4a   :  { %657 = vsyncadd [#allocation9], 4294966272  ;;  %v668_v0 = vmov 0.0   ;;  %vm669_vm0 = vmmov 0   ;;  %v524_v1 = vld [vmem:[#allocation5] sm:$0xff]   ;;  %v525_v2 = vld [vmem:[#allocation5 + $0x8] sm:$0xff]  }
  0x4b   :  { %465 = vmatprep.subr.bf16.mxu0 %v668_v0  ;;  %469 = vmatprep.mubr.msk.bf16.mxu0 %vm669_vm0, %v668_v0  ;;  %v83_v3 = vld [vmem:[#allocation2] sm:$0xff]  ;;  %v84_v4 = vld [vmem:[#allocation2 + $0x8] sm:$0xff]  ;;  %vm109_vm1 = vcmask 261120   ;;  %v528_v8 = vld [vmem:[#allocation7 + $0x10] sm:$0xff]   ;;  %s670_s9 = smov [#allocation10]  }
  0x4c   :  { %473 = vmatprep.subr.bf16.mxu1 %v668_v0  ;;  %489 = vmatprep.mubr.msk.bf16.mxu1 %vm669_vm0, %v668_v0  ;;  %v526_v5 = vld [vmem:[#allocation7] sm:$0xff]   ;;  %v85_v6 = vpack.c.bf16 %v84_v4, %v83_v3  ;;  %v527_v7 = vld [vmem:[#allocation7 + $0x8] sm:$0xff]   ;;  %v529_v9 = vld [vmem:[#allocation7 + $0x18] sm:$0xff]   ;;  %s399_s10 = sshll.u32 %s670_s9, 4  ;;  %s400_s10 = int_to_ptr.vmem [resolvable:$true] %s399_s10 }
  0x4d   :  { %466 = vmatpush3.bf16.msra.mxu0 %v524_v1  ;;  %474 = vmatpush3.bf16.msra.mxu1 %v526_v5  ;;  %v530_v10 = vld [vmem:[#allocation7 + $0x20] sm:$0xff]   ;;  %v531_v11 = vld [vmem:[#allocation7 + $0x28] sm:$0xff]   ;;  %v532_v12 = vld [vmem:[#allocation7 + $0x30] sm:$0xff]   ;;  %p635_p5 = scmp.lt.s32.totalorder %s400_s10, %s400_s10 }
  0x4e   :  { %467 = vmatprep.subr.bf16.mxu0 %v668_v0  ;;  %475 = vmatprep.subr.bf16.mxu1 %v668_v0  ;;  %v533_v13 = vld [vmem:[#allocation7 + $0x38] sm:$0xff]   ;;  %v534_v14 = vld [vmem:[#allocation8] sm:$0xff]   ;;  %v535_v15 = vld [vmem:[#allocation8 + $0x8] sm:$0xff]  }
  0x4f   :  { %v536_v16 = vld [vmem:[#allocation8 + $0x10] sm:$0xff]   ;;  %v537_v17 = vld [vmem:[#allocation8 + $0x18] sm:$0xff]   ;;  %v538_v18 = vld [vmem:[#allocation8 + $0x20] sm:$0xff]  }
  0x50   :  { %v539_v19 = vld [vmem:[#allocation8 + $0x28] sm:$0xff]   ;;  %v413_v20 = vld [vmem:[%s825_s2] ss:$0 sm:$0xff]  ;;  %v540_v30 = vld [vmem:[#allocation8 + $0x30] sm:$0xff]  }
  0x51   :  { %468 = vmatpush3.bf16.msra.mxu0 %v525_v2  ;;  %476 = vmatpush3.bf16.msra.mxu1 %v527_v7  ;;  %v541_v31 = vld [vmem:[#allocation8 + $0x38] sm:$0xff]   ;;  %v417_v32 = vld [vmem:[%s827_s4] ss:$0 sm:$0xff]  ;;  %s630_s4 = scalar_lea.vmem %s400_s10, 128 }
  0x52   :  { %493 = vmatprep.subr.bf16.mxu0 %v668_v0  ;;  %477 = vmatprep.subr.bf16.mxu1 %v668_v0  ;;  %v426_v42 = vld [vmem:[%s829_s6] ss:$0 sm:$0xff]  ;;  %p631_p4 = scmp.ne.s32.totalorder %s400_s10, %s630_s4  ;;  %p636_p6 = scmp.lt.s32.totalorder %s630_s4, %s630_s4 }
  0x54   :  { %470 = vmatmul.mubr.msk.bf16.vlgmr.msra.gmra.mrb[0].mxu0 %vm109_vm1, %v85_v6  ;;  %p637_p7 = por %p636_p6, %p635_p5 }
  0x55   :  { %509 = vmatprep.mubr.msk.bf16.mxu0 %vm669_vm0, %v668_v0  ;;  %478 = vmatpush3.bf16.msra.mxu1 %v528_v8 }
  0x56   :  { %479 = vmatprep.subr.bf16.mxu1 %v668_v0  ;;  %494 = vmatpush3.bf16.msra.mxu0 %v534_v14  ;;  %p638_p8 = pnand %p637_p7, %p631_p4 }
  0x57   :  { %495 = vmatprep.subr.bf16.mxu0 %v668_v0 }
  0x59   :  { %480 = vmatpush3.bf16.msra.mxu1 %v529_v9 }
  0x5a   :  { %481 = vmatprep.subr.bf16.mxu1 %v668_v0  ;;  %496 = vmatpush3.bf16.msra.mxu0 %v535_v15 }
  0x5b   :  { %497 = vmatprep.subr.bf16.mxu0 %v668_v0 }
  0x5d   :  { %482 = vmatpush3.bf16.msra.mxu1 %v530_v10 }
  0x5e   :  { %483 = vmatprep.subr.bf16.mxu1 %v668_v0  ;;  %498 = vmatpush3.bf16.msra.mxu0 %v536_v16 }
  0x5f   :  { %499 = vmatprep.subr.bf16.mxu0 %v668_v0 }
  0x61   :  { %484 = vmatpush3.bf16.msra.mxu1 %v531_v11 }
  0x62   :  { %485 = vmatprep.subr.bf16.mxu1 %v668_v0  ;;  %500 = vmatpush3.bf16.msra.mxu0 %v537_v17 }
  0x63   :  { %501 = vmatprep.subr.bf16.mxu0 %v668_v0 }
  0x65   :  { %486 = vmatpush3.bf16.msra.mxu1 %v532_v12 }
  0x66   :  { %487 = vmatprep.subr.bf16.mxu1 %v668_v0  ;;  %502 = vmatpush3.bf16.msra.mxu0 %v538_v18 }
  0x67   :  { %503 = vmatprep.subr.bf16.mxu0 %v668_v0 }
  0x69   :  { %488 = vmatpush3.bf16.msra.mxu1 %v533_v13 }
  0x6a   :  { %504 = vmatpush3.bf16.msra.mxu0 %v539_v19 }
  0x6b   :  { %505 = vmatprep.subr.bf16.mxu0 %v668_v0 }
  0x6e   :  { %506 = vmatpush3.bf16.msra.mxu0 %v540_v30 }
  0x6f   :  { %507 = vmatprep.subr.bf16.mxu0 %v668_v0 }
  0x72   :  { %508 = vmatpush3.bf16.msra.mxu0 %v541_v31 }
 0x127   :  { %v147_v21 = vpop.f32.mrb[0].mxu0 }
 0x128   :  { %v148_v22 = vadd.f32 %v413_v20, %v147_v21  ;;  %v471_v23 = vpop.f32.mrb[1].mxu0 }
 0x129   :  { %v150_v24 = vpop.f32.mrb[2].mxu0 }
 0x12a   :  { %v151_v25 = vadd.f32 %v413_v20, %v150_v24  ;;  %v472_v26 = vpop.f32.mrb[3].mxu0  ;;  %v154_v27 = vmax.f32 %v148_v22, 0.0 }
 0x12c   :  { %v155_v28 = vmax.f32 %v151_v25, 0.0 }
 0x12e   :  { %v156_v29 = vpack.c.bf16 %v155_v28, %v154_v27 }
 0x130   :  { %490 = vmatmul.mubr.bf16.vlgmr.msra.gmra.mrb[0].mxu1 %v156_v29 }
 0x203   :  { %v262_v33 = vpop.f32.mrb[0].mxu1 }
 0x204   :  { %v263_v34 = vadd.f32 %v417_v32, %v262_v33  ;;  %v491_v35 = vpop.f32.mrb[1].mxu1 }
 0x205   :  { %v265_v36 = vpop.f32.mrb[2].mxu1 }
 0x206   :  { %v266_v37 = vadd.f32 %v417_v32, %v265_v36  ;;  %v492_v38 = vpop.f32.mrb[3].mxu1  ;;  %v269_v39 = vmax.f32 %v263_v34, 0.0 }
 0x208   :  { %v270_v40 = vmax.f32 %v266_v37, 0.0 }
 0x20a   :  { %v271_v41 = vpack.c.bf16 %v270_v40, %v269_v39 }
 0x20c   :  { %510 = vmatmul.mubr.bf16.vlgmr.msra.gmra.mrb[4].mxu0 %v271_v41 }
 0x2df   :  { %v377_v43 = vpop.f32.mrb[4].mxu0 }
 0x2e0   :  { %v511_v44 = vpop.f32.mrb[5].mxu0  ;;  %v378_v46 = vadd.f32 %v426_v42, %v377_v43 }
 0x2e1   :  { %v380_v45 = vpop.f32.mrb[6].mxu0 }
 0x2e2   :  { %v381_v47 = vadd.f32 %v426_v42, %v380_v45  ;;  %v512_v48 = vpop.f32.mrb[7].mxu0 }
 0x2e4   :  { %v442_v49 = vpack.c.bf16 %v381_v47, %v378_v46 }
 0x2e6   :  { %443 = vst [vmem:[#allocation10] sm:$0xff] %v442_v49  }
 0x2e7   :  { %641 = shalt.err (!%p638_p8)
}
 0x2e8   :  { %s642_s14 = scalar_lea.hbm %s830_s7, 128 }
 0x2e9   :  { %p643_p9 = scmp.ne.s32.totalorder %s830_s7, %s642_s14  ;;  %p646_p10 = scmp.lt.u32.totalorder %s642_s14, %s830_s7 }
 0x2eb   :  { %p648_p11 = pnand %p646_p10, %p643_p9 }
 0x2ed   :  { %651 = shalt.err (!%p648_p11)
}
 0x2ee   :  { %405 = dma.vmem_to_hbm [thread:$0]  %s400_s10, 128, %s830_s7, [#allocation4], %s661_s11, %s661_s11, %s662_s12  }
 0x2ef   :  { %658 = dma.done.wait [#allocation4], 128  }
 0x2f0   :  { %659 = vsyncadd [#allocation4], 4294967168 }
 0x2f1   :  { %409 = vsyncpa [#allocation3], 1 }
 0x2f2   :  { %410 = vsyncpa [#allocation6], 1 }
 0x2f3   :  { %411 = vsyncpa [#allocation9], 1 }
 0x2f4   :  { %412 = vsyncpa [#allocation4], 1 }

</bundles_post_ra>
